<compile_context>
chip_gen: v7x
topology: tpu7x:2x2x1
jax: 0.10.0
libtpu: 0.0.40
codegen_flags: <defaults>
</compile_context>

<pallas_src>
import jax
import jax.numpy as jnp
from jax.experimental import pallas as pl
from jax.experimental.pallas import tpu as pltpu

IN_DIM, HIDDEN, OUT_DIM = 300, 32, 4


def mlp_kernel(x_ref, w1_ref, b1_ref, w2_ref, b2_ref, o_ref):
    # Hidden layer: [TB, 300] @ [300, 32] with f32 MXU accumulation,
    # then bias add + ReLU on the VPU in f32.
    h = jnp.dot(x_ref[...], w1_ref[...], preferred_element_type=jnp.float32)
    h = jnp.maximum(h + b1_ref[...], 0.0)
    # Output layer: [TB, 32] @ [32, 4] + [1, 4] (all f32).
    out = jnp.dot(h, w2_ref[...], preferred_element_type=jnp.float32) + b2_ref[...]
    o_ref[...] = out.astype(o_ref.dtype)


def _round_up(n, m):
    return ((n + m - 1) // m) * m


def _pick_tile_and_vmem_limit(B, block_b, x_itemsize):
    """Per-generation batch-tile and scoped-VMEM-limit selection."""
    try:
        vmem_cap = int(pltpu.get_tpu_info().vmem_capacity_bytes)
    except Exception:
        vmem_cap = 64 << 20  # conservative fallback (v7x per-TC VMEM)

    # VMEM cost per tile row with (8,128)-padded lane widths:
    #   X double-buffered (300 -> 384 lanes) + out double-buffered (4 -> 128 lanes, f32).
    per_row = 2 * 384 * x_itemsize + 2 * 128 * 4
    # Keep ~30% headroom for resident weights + compiler scratch; hard-cap at
    # 8192 rows (diminishing returns, and protects the v7x 64 MiB ceiling).
    tb_cap = max(8, (int(vmem_cap * 0.7) // per_row) // 8 * 8)
    tb_cap = min(tb_cap, 8192)

    tb = min(_round_up(block_b, 8), _round_up(B, 8), tb_cap)
    # Megacore (v7x, 2 TCs): for large batches make sure there are >= 2 grid
    # steps; tiny batches stay a single step (per-step overhead dominates).
    if B >= 2048:
        tb = min(tb, _round_up(-(-B // 2), 8))
    tb = max(tb, 8)

    # Resident operands (double-buffered, lane/sublane padded) + slack.
    weights_bytes = 2 * (304 * 128 * 4 + 3 * 8 * 128 * 4)
    est = tb * per_row + weights_bytes + (1 << 20)
    # Raise the scoped limit above v5e's 16 MiB default, never above physical.
    vmem_limit = int(min(vmem_cap, max(est, 32 << 20)))
    return tb, vmem_limit


def mlp_forward(x, w1, b1, w2, b2, *, block_b=4096):
    """Forward pass of Linear(300,32) -> ReLU -> Linear(32,4).

    x:  [B, 300], f32 (or bf16 if it is already stored bf16 upstream; the
        wrapper never casts X -- that would cost an extra full HBM pass).
    w1: [300, 32], b1: [32] or [1, 32], w2: [32, 4], b2: [4] or [1, 4].
    """
    B, in_dim = x.shape
    hidden = w1.shape[1]
    out_dim = w2.shape[1]
    out_dtype = x.dtype

    # Match W1 to X's dtype so the MXU sees a homogeneous operand pair
    # (tiny one-time cast).  Everything elementwise stays f32.
    w1 = w1.astype(x.dtype)
    b1 = b1.astype(jnp.float32).reshape(1, hidden)
    w2 = w2.astype(jnp.float32)
    b2 = b2.astype(jnp.float32).reshape(1, out_dim)

    tb, vmem_limit = _pick_tile_and_vmem_limit(B, block_b, x.dtype.itemsize)
    grid = (pl.cdiv(B, tb),)

    itemsize = x.dtype.itemsize
    cost = pl.CostEstimate(
        flops=2 * B * in_dim * hidden + 2 * B * hidden * out_dim,
        transcendentals=0,
        bytes_accessed=(B * in_dim * itemsize            # stream X
                        + B * out_dim * itemsize         # write out
                        + in_dim * hidden * itemsize     # W1 (once)
                        + (hidden + hidden * out_dim + out_dim) * 4),
    )

    out = pl.pallas_call(
        mlp_kernel,
        out_shape=jax.ShapeDtypeStruct((B, out_dim), out_dtype),
        grid=grid,
        in_specs=[
            # X: one batch tile per grid step; the final block may be partial.
            # OOB rows only feed output rows whose stores Pallas drops.
            pl.BlockSpec((tb, in_dim), lambda i: (i, 0)),
            # Resident operands: constant block index -> fetched once.
            pl.BlockSpec(w1.shape, lambda i: (0, 0)),
            pl.BlockSpec(b1.shape, lambda i: (0, 0)),
            pl.BlockSpec(w2.shape, lambda i: (0, 0)),
            pl.BlockSpec(b2.shape, lambda i: (0, 0)),
        ],
        out_specs=pl.BlockSpec((tb, out_dim), lambda i: (i, 0)),
        compiler_params=pltpu.CompilerParams(
            # Independent batch tiles: let megacore (v7x) shard across cores.
            dimension_semantics=("parallel",),
            vmem_limit_bytes=vmem_limit,
        ),
        cost_estimate=cost,
    )(x, w1, b1, w2, b2)

    return out


def init_params(key, in_dim=IN_DIM, hidden=HIDDEN, out_dim=OUT_DIM, dtype=jnp.float32):
    # Deterministic init mimicking torch.nn.Linear's U(-1/sqrt(fan_in), 1/sqrt(fan_in)).
    k1, k2, k3, k4 = jax.random.split(key, 4)
    lim1 = 1.0 / jnp.sqrt(jnp.float32(in_dim))
    lim2 = 1.0 / jnp.sqrt(jnp.float32(hidden))
    w1 = jax.random.uniform(k1, (in_dim, hidden), dtype, -lim1, lim1)
    b1 = jax.random.uniform(k2, (1, hidden), dtype, -lim1, lim1)
    w2 = jax.random.uniform(k3, (hidden, out_dim), dtype, -lim2, lim2)
    b2 = jax.random.uniform(k4, (1, out_dim), dtype, -lim2, lim2)
    return w1, b1, w2, b2


if __name__ == "__main__":
    key = jax.random.PRNGKey(0)
    k_x, k_p, k_x2 = jax.random.split(key, 3)

    B = 8
    x = jax.random.normal(k_x, (B, IN_DIM), jnp.float32)
    w1, b1, w2, b2 = init_params(k_p)

    def ref_fn(xx):
        return jnp.maximum(xx.astype(jnp.float32) @ w1 + b1, 0.0) @ w2 + b2

    # 1) Small batch, full f32 (exact module semantics), single grid step.
    y = jax.block_until_ready(mlp_forward(x, w1, b1, w2, b2))
    assert y.shape == (B, OUT_DIM)
    assert jnp.allclose(y, ref_fn(x), atol=1e-5, rtol=1e-5)

    # 2) Ragged batch: small block_b forces several grid steps plus a partial
    #    final block (no wrapper-side padding or output slicing anymore).
    B2 = 200
    x2 = jax.random.normal(k_x2, (B2, IN_DIM), jnp.float32)
    y2 = jax.block_until_ready(mlp_forward(x2, w1, b1, w2, b2, block_b=64))
    assert y2.shape == (B2, OUT_DIM)
    assert jnp.allclose(y2, ref_fn(x2), atol=1e-5, rtol=1e-5)

    # 3) bf16-at-source streaming (X already stored in bf16 upstream); f32
    #    accumulation, looser tolerance (not bit-equivalent to the torch module).
    x3 = x2.astype(jnp.bfloat16)
    y3 = jax.block_until_ready(mlp_forward(x3, w1, b1, w2, b2, block_b=64))
    assert y3.shape == (B2, OUT_DIM)
    assert jnp.allclose(y3.astype(jnp.float32), ref_fn(x3), atol=5e-2, rtol=5e-2)

    print("KERNEL_OK")
</pallas_src>

<mosaic_0001>
module attributes {stable_mosaic.version = 11 : i64} {
  func.func @mlp_kernel(%arg0: i32, %arg1: memref<8x300xf32, #tpu.memory_space<vmem>>, %arg2: memref<300x32xf32, #tpu.memory_space<vmem>>, %arg3: memref<1x32xf32, #tpu.memory_space<vmem>>, %arg4: memref<32x4xf32, #tpu.memory_space<vmem>>, %arg5: memref<1x4xf32, #tpu.memory_space<vmem>>, %arg6: memref<8x4xf32, #tpu.memory_space<vmem>>) attributes {dimension_semantics = [#tpu.dimension_semantics<parallel>], iteration_bounds = array<i64: 1>, scalar_prefetch = 0 : i64, scratch_operands = 0 : i64, tpu.core_type = #tpu.core_type<tc>, window_params = [{transform_indices = @transform_0, window_bounds = array<i64: 8, 300>}, {pipeline_mode = #tpu.pipeline_mode<synchronous>, transform_indices = @transform_1, window_bounds = array<i64: 300, 32>}, {pipeline_mode = #tpu.pipeline_mode<synchronous>, transform_indices = @transform_2, window_bounds = array<i64: 1, 32>}, {pipeline_mode = #tpu.pipeline_mode<synchronous>, transform_indices = @transform_3, window_bounds = array<i64: 32, 4>}, {pipeline_mode = #tpu.pipeline_mode<synchronous>, transform_indices = @transform_4, window_bounds = array<i64: 1, 4>}, {transform_indices = @transform_5, window_bounds = array<i64: 8, 4>}]} {
    %c0 = arith.constant 0 : index
    %c0_0 = arith.constant 0 : index
    %0 = vector.load %arg1[%c0, %c0_0] : memref<8x300xf32, #tpu.memory_space<vmem>>, vector<8x300xf32>
    %c0_1 = arith.constant 0 : index
    %c0_2 = arith.constant 0 : index
    %1 = vector.load %arg2[%c0_1, %c0_2] : memref<300x32xf32, #tpu.memory_space<vmem>>, vector<300x32xf32>
    %cst = arith.constant dense<0.000000e+00> : vector<8x32xf32>
    %2 = tpu.matmul %0, %1, %cst {dimension_numbers = #tpu.dot_dimension_numbers<[1], [0], [0], [1], [0, 0, 1, 1], [], []>} : vector<8x300xf32>, vector<300x32xf32>, vector<8x32xf32> -> vector<8x32xf32>
    %c0_3 = arith.constant 0 : index
    %c0_4 = arith.constant 0 : index
    %3 = vector.load %arg3[%c0_3, %c0_4] : memref<1x32xf32, #tpu.memory_space<vmem>>, vector<1x32xf32>
    %4 = vector.broadcast %3 : vector<1x32xf32> to vector<8x32xf32>
    %5 = arith.addf %2, %4 : vector<8x32xf32>
    %cst_5 = arith.constant 0.000000e+00 : f32
    %6 = vector.broadcast %cst_5 : f32 to vector<8x32xf32>
    %7 = arith.maximumf %5, %6 : vector<8x32xf32>
    %c0_6 = arith.constant 0 : index
    %c0_7 = arith.constant 0 : index
    %8 = vector.load %arg4[%c0_6, %c0_7] : memref<32x4xf32, #tpu.memory_space<vmem>>, vector<32x4xf32>
    %cst_8 = arith.constant dense<0.000000e+00> : vector<8x4xf32>
    %9 = tpu.matmul %7, %8, %cst_8 {dimension_numbers = #tpu.dot_dimension_numbers<[1], [0], [0], [1], [0, 0, 1, 1], [], []>} : vector<8x32xf32>, vector<32x4xf32>, vector<8x4xf32> -> vector<8x4xf32>
    %c0_9 = arith.constant 0 : index
    %c0_10 = arith.constant 0 : index
    %10 = vector.load %arg5[%c0_9, %c0_10] : memref<1x4xf32, #tpu.memory_space<vmem>>, vector<1x4xf32>
    %11 = vector.broadcast %10 : vector<1x4xf32> to vector<8x4xf32>
    %12 = arith.addf %9, %11 : vector<8x4xf32>
    %c0_11 = arith.constant 0 : index
    %c0_12 = arith.constant 0 : index
    %13 = vector.load %arg6[%c0_11, %c0_12] : memref<8x4xf32, #tpu.memory_space<vmem>>, vector<8x4xf32>
    tpu.vector_store %arg6[%c0_11, %c0_12], %12 {strides = array<i32>} : memref<8x4xf32, #tpu.memory_space<vmem>>, vector<8x4xf32>,
    return
  }
  func.func @transform_0(%arg0: i32) -> (i32, i32) {
    %c0_i32 = arith.constant 0 : i32
    %c0_i32_0 = arith.constant 0 : i32
    return %arg0, %c0_i32 : i32, i32
  }
  func.func @transform_1(%arg0: i32) -> (i32, i32) {
    %c0_i32 = arith.constant 0 : i32
    %c0_i32_0 = arith.constant 0 : i32
    %c0_i32_1 = arith.constant 0 : i32
    return %c0_i32, %c0_i32_0 : i32, i32
  }
  func.func @transform_2(%arg0: i32) -> (i32, i32) {
    %c0_i32 = arith.constant 0 : i32
    %c0_i32_0 = arith.constant 0 : i32
    %c0_i32_1 = arith.constant 0 : i32
    return %c0_i32, %c0_i32_0 : i32, i32
  }
  func.func @transform_3(%arg0: i32) -> (i32, i32) {
    %c0_i32 = arith.constant 0 : i32
    %c0_i32_0 = arith.constant 0 : i32
    %c0_i32_1 = arith.constant 0 : i32
    return %c0_i32, %c0_i32_0 : i32, i32
  }
  func.func @transform_4(%arg0: i32) -> (i32, i32) {
    %c0_i32 = arith.constant 0 : i32
    %c0_i32_0 = arith.constant 0 : i32
    %c0_i32_1 = arith.constant 0 : i32
    return %c0_i32, %c0_i32_0 : i32, i32
  }
  func.func @transform_5(%arg0: i32) -> (i32, i32) {
    %c0_i32 = arith.constant 0 : i32
    %c0_i32_0 = arith.constant 0 : i32
    return %arg0, %c0_i32 : i32, i32
  }
}

</mosaic_0001>

<bundles_post_ra>
// kernel: tpu_custom_call.1
= control target key start
LH: loop header
LB: loop body
LE: loop exit
PB: predicated region body
PF: predicated region fallthrough
CT: control target
= control target key end

     0   :  { %v438_v3 = vmov 0.0|0.0   ;;  %vm439_vm0 = vmmov 0   ;;  %v440_v8 = vmov 0.0   ;;  %vm72_vm1 = vcmask 1043456   ;;  %s625_s1 = inlined_call_operand.vmem [shape: f32[300,32], index: 1, kind: input, shape index: {}]   ;;  %s626_s0 = inlined_call_operand.vmem [shape: f32[8,300], index: 0, kind: input, shape index: {}]   ;;  %s627_s3 = inlined_call_operand.vmem [shape: f32[32,4], index: 3, kind: input, shape index: {}]   ;;  %s628_s2 = inlined_call_operand.vmem [shape: f32[1,32], index: 2, kind: input, shape index: {}]   ;;  %s629_s4 = inlined_call_operand.vmem [shape: f32[1,4], index: 4, kind: input, shape index: {}]   ;;  %s630_s5 = inlined_call_operand.vmem [shape: f32[8,4], index: 5, kind: output, shape index: {}]  }
   0x1   :  { %v39_v0 = vld [vmem:[%s625_s1 + $0x80] sm:$0xff]  ;;  %v40_v1 = vld [vmem:[%s625_s1 + $0x88] sm:$0xff]  ;;  %418 = vmatprep.subr.bf16.mxu1 %v438_v3  ;;  %v41_v6 = vld [vmem:[%s625_s1 + $0x90] sm:$0xff]  ;;  %372 = vmatprep.mubr.msk.f32.mxu1 %vm439_vm0, %v440_v8  ;;  %vm441_vm2 = vmmov 1   ;;  %vm68_vm4 = vcmask 359424   ;;  %vm228_vm5 = vcmask 261120  }
   0x2   :  { %v23_v2 = vld [vmem:[%s625_s1] sm:$0xff]  ;;  %v386_v4 = vpack.c.bf16 %v40_v1, %v39_v0  ;;  %v24_v5 = vld [vmem:[%s625_s1 + $0x8] sm:$0xff]  ;;  %v42_v7 = vld [vmem:[%s625_s1 + $0x98] sm:$0xff]  ;;  %vm302_vm6 = vcmask 31744  }
   0x3   :  { %v388_v9 = vpack.c.bf16 %v24_v5, %v23_v2  ;;  %v390_v10 = vpack.c.bf16 %v42_v7, %v41_v6  ;;  %v25_v11 = vld [vmem:[%s625_s1 + $0x10] sm:$0xff]  ;;  %v26_v12 = vld [vmem:[%s625_s1 + $0x18] sm:$0xff]  ;;  %v43_v13 = vld [vmem:[%s625_s1 + $0xa0] sm:$0xff] }
   0x4   :  { %387 = vmatprep.subr.bf16.mxu0 %v386_v4  ;;  %v44_v14 = vld [vmem:[%s625_s1 + $0xa8] sm:$0xff]  ;;  %v392_v15 = vpack.c.bf16 %v26_v12, %v25_v11  ;;  %v27_v17 = vld [vmem:[%s625_s1 + $0x20] sm:$0xff]  ;;  %v45_v19 = vld [vmem:[%s625_s1 + $0xb0] sm:$0xff] }
   0x5   :  { %389 = vmatpush3.bf16.msra.mxu0 %v388_v9  ;;  %v394_v16 = vpack.c.bf16 %v44_v14, %v43_v13  ;;  %v28_v18 = vld [vmem:[%s625_s1 + $0x28] sm:$0xff]  ;;  %v46_v20 = vld [vmem:[%s625_s1 + $0xb8] sm:$0xff]  ;;  %v29_v22 = vld [vmem:[%s625_s1 + $0x30] sm:$0xff] }
   0x6   :  { %391 = vmatprep.subr.bf16.mxu0 %v390_v10  ;;  %v396_v21 = vpack.c.bf16 %v28_v18, %v27_v17  ;;  %v398_v23 = vpack.c.bf16 %v46_v20, %v45_v19  ;;  %v30_v24 = vld [vmem:[%s625_s1 + $0x38] sm:$0xff]  ;;  %v55_v25 = vld [vmem:[%s625_s1 + $0x100] sm:$0xff]  ;;  %v56_v26 = vld [vmem:[%s625_s1 + $0x108] sm:$0xff] }
   0x7   :  { %v47_v27 = vld [vmem:[%s625_s1 + $0xc0] sm:$0xff]  ;;  %v48_v28 = vld [vmem:[%s625_s1 + $0xc8] sm:$0xff]  ;;  %v419_v29 = vpack.c.bf16 %v56_v26, %v55_v25  ;;  %v57_v30 = vld [vmem:[%s625_s1 + $0x110] sm:$0xff]  ;;  %v400_v32 = vpack.c.bf16 %v30_v24, %v29_v22 }
   0x8   :  { %v58_v31 = vld [vmem:[%s625_s1 + $0x118] sm:$0xff]  ;;  %v31_v33 = vld [vmem:[%s625_s1 + $0x40] sm:$0xff]  ;;  %v21_v35 = vld [vmem:[%s626_s0 + $0x8] sm:$0xff]  ;;  %v402_v36 = vpack.c.bf16 %v48_v28, %v47_v27 }
   0x9   :  { %393 = vmatpush3.bf16.msra.mxu0 %v392_v15  ;;  %420 = vmatpush3.bf16.msra.mxu1 %v419_v29  ;;  %v422_v34 = vpack.c.bf16 %v58_v31, %v57_v30  ;;  %v32_v37 = vld [vmem:[%s625_s1 + $0x48] sm:$0xff]  ;;  %v59_v38 = vld [vmem:[%s625_s1 + $0x120] sm:$0xff]  ;;  %v49_v40 = vld [vmem:[%s625_s1 + $0xd0] sm:$0xff] }
   0xa   :  { %395 = vmatprep.subr.bf16.mxu0 %v394_v16  ;;  %421 = vmatprep.subr.bf16.mxu1 %v438_v3  ;;  %v60_v39 = vld [vmem:[%s625_s1 + $0x128] sm:$0xf]  ;;  %v50_v41 = vld [vmem:[%s625_s1 + $0xd8] sm:$0xff]  ;;  %v404_v42 = vpack.c.bf16 %v32_v37, %v31_v33  ;;  %v33_v45 = vld [vmem:[%s625_s1 + $0x50] sm:$0xff] }
   0xb   :  { %140 = vmatprep.mubr.f32.mxu0 %v21_v35  ;;  %v425_v43 = vpack.c.bf16 %v60_v39, %v59_v38  ;;  %v406_v44 = vpack.c.bf16 %v50_v41, %v49_v40  ;;  %v34_v46 = vld [vmem:[%s625_s1 + $0x58] sm:$0xff]  ;;  %vm426_vm3 = vmpackc.low %vm72_vm1, %vm441_vm2  ;;  %v51_v47 = vld [vmem:[%s625_s1 + $0xe0] sm:$0xff] }
   0xc   :  { %v52_v48 = vld [vmem:[%s625_s1 + $0xe8] sm:$0xff]  ;;  %v408_v49 = vpack.c.bf16 %v34_v46, %v33_v45  ;;  %v22_v50 = vld [vmem:[%s626_s0 + $0x10] sm:$0xff]  ;;  %v35_v52 = vld [vmem:[%s625_s1 + $0x60] sm:$0xff] }
   0xd   :  { %397 = vmatpush3.bf16.msra.mxu0 %v396_v21  ;;  %423 = vmatpush3.bf16.msra.mxu1 %v422_v34  ;;  %v410_v51 = vpack.c.bf16 %v52_v48, %v51_v47  ;;  %v36_v53 = vld [vmem:[%s625_s1 + $0x68] sm:$0xff]  ;;  %v53_v54 = vld [vmem:[%s625_s1 + $0xf0] sm:$0xff]  ;;  %v54_v55 = vld [vmem:[%s625_s1 + $0xf8] sm:$0xff] }
   0xe   :  { %399 = vmatprep.subr.bf16.mxu0 %v398_v23  ;;  %424 = vmatprep.subr.bf16.mxu1 %v438_v3  ;;  %v412_v56 = vpack.c.bf16 %v36_v53, %v35_v52  ;;  %v414_v57 = vpack.c.bf16 %v54_v55, %v53_v54  ;;  %v37_v58 = vld [vmem:[%s625_s1 + $0x70] sm:$0xff]  ;;  %v38_v59 = vld [vmem:[%s625_s1 + $0x78] sm:$0xff]  ;;  %v20_v61 = vld [vmem:[%s626_s0] sm:$0xff] }
   0xf   :  { %v416_v60 = vpack.c.bf16 %v38_v59, %v37_v58  ;;  %v217_v62 = vld [vmem:[%s627_s3] sm:$0xff]  ;;  %v218_v63 = vld [vmem:[%s627_s3 + $0x8] sm:$0xff]  ;;  %v219_v1 = vld [vmem:[%s627_s3 + $0x10] sm:$0xff] }
  0x10   :  { %v429_v0 = vpack.c.bf16 %v218_v63, %v217_v62  ;;  %v220_v2 = vld [vmem:[%s627_s3 + $0x18] sm:$0xff]  ;;  %v308_v9 = vld [vmem:[%s628_s2] ss:$0 sm:$0xff] }
  0x11   :  { %401 = vmatpush3.bf16.msra.mxu0 %v400_v32  ;;  %427 = vmatpush3.bf16.msk.msra.mxu1 %vm426_vm3, %v425_v43  ;;  %v432_v4 = vpack.c.bf16 %v220_v2, %v219_v1  ;;  %v311_v13 = vld [vmem:[%s629_s4] ss:$0 sm:$0xff] }
  0x12   :  { %403 = vmatprep.subr.bf16.mxu0 %v402_v36  ;;  %428 = vmatprep.subr.bf16.mxu1 %v438_v3 }
  0x14   :  { %373 = vmatmul.mubr.msk.f32.vlgmr.msra.gmra.mrb[0].mxu1 %vm68_vm4, %v22_v50 }
  0x15   :  { %405 = vmatpush3.bf16.msra.mxu0 %v404_v42  ;;  %383 = vmatprep.mubr.msk.f32.mxu1 %vm439_vm0, %v440_v8 }
  0x16   :  { %407 = vmatprep.subr.bf16.mxu0 %v406_v44  ;;  %430 = vmatpush3.bf16.msra.mxu1 %v429_v0 }
  0x17   :  { %431 = vmatprep.subr.bf16.mxu1 %v438_v3 }
  0x19   :  { %409 = vmatpush3.bf16.msra.mxu0 %v408_v49 }
  0x1a   :  { %411 = vmatprep.subr.bf16.mxu0 %v410_v51  ;;  %433 = vmatpush3.bf16.msra.mxu1 %v432_v4 }
  0x1d   :  { %413 = vmatpush3.bf16.msra.mxu0 %v412_v56 }
  0x1e   :  { %415 = vmatprep.subr.bf16.mxu0 %v414_v57 }
  0x21   :  { %417 = vmatpush3.bf16.msra.mxu0 %v416_v60 }
  0x24   :  { %141 = vmatmul.mubr.f32.vlgmr.msra.gmra.mrb[0].mxu0 %v20_v61 }
  0xe7   :  { %v212_v5 = vpop.f32.mrb[0].mxu1 }
  0xe8   :  { %v374_v6 = vpop.f32.mrb[1].mxu1 }
  0xf7   :  { %v345_v7 = vpop.f32.mrb[0].mxu0 }
  0xf8   :  { %v346_v8 = vpop.f32.mrb[1].mxu0 }
  0xf9   :  { %v347_v10 = vadd.f32 %v346_v8, %v345_v7 }
  0xfb   :  { %v143_v3 = vadd.f32 %v347_v10, %v308_v9 }
  0xfd   :  { %v213_v11 = vadd.f32 %v212_v5, %v143_v3 }
  0xff   :  { %v216_v12 = vmax.f32 %v213_v11, 0.0 }
 0x101   :  { %384 = vmatmul.mubr.msk.f32.vlgmr.msra.gmra.mrb[2].mxu1 %vm228_vm5, %v216_v12 }
 0x1d4   :  { %v298_v14 = vpop.f32.mrb[2].mxu1 }
 0x1d5   :  { %v299_v15 = vadd.f32 %v311_v13, %v298_v14  ;;  %v385_v16 = vpop.f32.mrb[3].mxu1 }
 0x1d7   :  { %303 = vst.msk [vmem:[%s630_s5] sm:$0xff] %vm302_vm6, %v299_v15 }

</bundles_post_ra>
